<compile_context>
chip_gen: v7x
topology: tpu7x:2x2x1
jax: 0.10.0
libtpu: 0.0.40
codegen_flags: <defaults>
</compile_context>

<pallas_src>
import functools

import jax
import jax.numpy as jnp
import numpy as np
from jax import lax
from jax.experimental import pallas as pl
from jax.experimental.pallas import tpu as pltpu

# MXU operand dtype (bf16-native MXUs on v5e/v6e/v7x); gate math stays in f32.
MXU_DTYPE = jnp.bfloat16


def _device_kind():
    try:
        return jax.devices()[0].device_kind.lower()
    except Exception:
        return ""


_IS_V5_OR_OLDER = any(t in _device_kind() for t in ("v2", "v3", "v4", "v5"))
# Block-diag n-gate fusion fills the 256x256 MXU on v6e/v7x but doubles MAC
# count for no win on v5e's native 128x128 MXU (review #4/#5).
_FUSE_N_GATES_DEFAULT = not _IS_V5_OR_OLDER
# On v6e/v7x lift the row gather to an XLA jnp.take and stream the duplicated
# operands; keep the in-kernel gather on v5e (review #2/#3).
_STREAM_GATHER_DEFAULT = not _IS_V5_OR_OLDER


# ----------------------------------------------------------------------------
# Capability probe: single-buffer grid-invariant blocks with pl.Buffered(1).
# ----------------------------------------------------------------------------
@functools.lru_cache(maxsize=None)
def _single_buffer_consts_supported():
    try:
        buf1 = pl.Buffered(1)

        def _k(s_ref, x_ref, o_ref, tmp_ref):
            tmp_ref[...] = x_ref[...] * 2.0
            o_ref[...] = tmp_ref[...]

        gs = pltpu.PrefetchScalarGridSpec(
            num_scalar_prefetch=1, grid=(2,),
            in_specs=[pl.BlockSpec((8, 128), lambda t, s: (0, 0),
                                   pipeline_mode=buf1)],
            out_specs=pl.BlockSpec((8, 128), lambda t, s: (0, 0)),
            scratch_shapes=[pltpu.VMEM((8, 128), jnp.float32)])
        x = jnp.arange(8 * 128, dtype=jnp.float32).reshape(8, 128)
        y = pl.pallas_call(
            _k, out_shape=jax.ShapeDtypeStruct((8, 128), jnp.float32),
            grid_spec=gs)(jnp.zeros((1,), jnp.int32), x)
        return bool(jnp.allclose(jax.block_until_ready(y), x * 2.0))
    except Exception:
        return False


def _const_spec(block_shape, index_map):
    """BlockSpec for a grid-invariant block; single-buffered when supported."""
    if _single_buffer_consts_supported():
        return pl.BlockSpec(block_shape, index_map, pipeline_mode=pl.Buffered(1))
    return pl.BlockSpec(block_shape, index_map)


# ----------------------------------------------------------------------------
# Tiling: batch elements per grid step.
# ----------------------------------------------------------------------------
def _pick_tile_b(n_batch, n_nodes, hidden, target_rows=256):
    """Constraints / preferences (review #8/#9/#10):
      * tile_b divides n_batch; (tile_b*n_nodes) sublane-legal (multiple of 8 or
        the full output axis) -- no whole-batch fallback jumps.
      * per-step f32 working set (~14 * tile_m * H bytes) capped at ~20 MiB so
        the kernel fits v7x's 64 MiB VMEM next to the resident table / weights.
      * aim for ~target_rows GRU rows per MXU tile, but prefer >=2 grid steps
        (both v7x TensorCores) when that keeps >= half the row target.
    """
    nn = n_nodes * n_nodes
    bn = n_batch * n_nodes
    max_tile_m = max(nn, (20 << 20) // (14 * hidden * 4))
    valid = [tb for tb in range(1, n_batch + 1)
             if n_batch % tb == 0
             and ((tb * n_nodes) % 8 == 0 or tb * n_nodes == bn)]
    if not valid:
        valid = [n_batch]
    fitting = [tb for tb in valid if tb * nn <= max_tile_m] or [min(valid)]
    under = [tb for tb in fitting if tb * nn <= target_rows]
    best = max(under) if under else min(fitting)
    if n_batch // best < 2:
        alt = [tb for tb in fitting
               if n_batch // tb >= 2 and 2 * tb * nn >= min(target_rows, best * nn)]
        if alt:
            best = max(alt)
    return best


# ----------------------------------------------------------------------------
# GRU weight preparation (torch GRUCell layout -> fused MXU blocks).
# ----------------------------------------------------------------------------
def _prep_gru_weights(gru_params, hidden, fuse_n):
    """fuse_n=True : single (2H, 4H) bf16 weight = [W_rz | blockdiag(W_nx, W_nh)].
       fuse_n=False: (2H, 2H) fused r/z weight + two (H, H) n-gate weights."""
    w_ih, w_hh, b_ih, b_hh = gru_params
    H = hidden
    wi = jnp.asarray(w_ih, jnp.float32).T        # (H, 3H): cols [r | z | n]
    wh = jnp.asarray(w_hh, jnp.float32).T        # (H, 3H)
    w_rz = jnp.concatenate([wi[:, :2 * H], wh[:, :2 * H]], axis=0)   # (2H, 2H)
    b_rz = (b_ih[:2 * H] + b_hh[:2 * H]).reshape(1, 2 * H).astype(jnp.float32)
    b_nx = jnp.asarray(b_ih[2 * H:], jnp.float32).reshape(1, H)
    b_nh = jnp.asarray(b_hh[2 * H:], jnp.float32).reshape(1, H)
    if fuse_n:
        zero = jnp.zeros((H, H), jnp.float32)
        w_n = jnp.concatenate(
            [jnp.concatenate([wi[:, 2 * H:], zero], axis=1),
             jnp.concatenate([zero, wh[:, 2 * H:]], axis=1)], axis=0)   # (2H,2H)
        w_all = jnp.concatenate([w_rz, w_n], axis=1).astype(MXU_DTYPE)  # (2H,4H)
        b_all = jnp.concatenate([b_rz, b_nx, b_nh], axis=1)             # (1, 4H)
        return (w_all,), (b_all,)
    return ((w_rz.astype(MXU_DTYPE),
             wi[:, 2 * H:].astype(MXU_DTYPE),
             wh[:, 2 * H:].astype(MXU_DTYPE)),
            (b_rz, b_nx, b_nh))


# ----------------------------------------------------------------------------
# Shared in-kernel gate math + parent-axis reduction / store.
# ----------------------------------------------------------------------------
def _gru_gates(xh16, h, w_refs, b_refs, hidden, fuse_n):
    """PyTorch GRUCell math on a (tile_m, 2H) bf16 LHS; returns new_h (f32)."""
    H = hidden
    if fuse_n:
        (w_ref,), (b_ref,) = w_refs, b_refs
        g = jnp.dot(xh16, w_ref[...],
                    preferred_element_type=jnp.float32) + b_ref[...]
        r = jax.nn.sigmoid(g[:, :H])
        z = jax.nn.sigmoid(g[:, H:2 * H])
        n = jnp.tanh(g[:, 2 * H:3 * H] + r * g[:, 3 * H:])
    else:
        w_rz_ref, w_nx_ref, w_nh_ref = w_refs
        b_rz_ref, b_nx_ref, b_nh_ref = b_refs
        g_rz = jnp.dot(xh16, w_rz_ref[...],
                       preferred_element_type=jnp.float32) + b_rz_ref[...]
        r = jax.nn.sigmoid(g_rz[:, :H])
        z = jax.nn.sigmoid(g_rz[:, H:])
        gi_n = jnp.dot(xh16[:, :H], w_nx_ref[...],
                       preferred_element_type=jnp.float32) + b_nx_ref[...]
        gh_n = jnp.dot(xh16[:, H:], w_nh_ref[...],
                       preferred_element_type=jnp.float32) + b_nh_ref[...]
        n = jnp.tanh(gi_n + r * gh_n)
    return (1.0 - z) * n + z * h


def _store_parent_sum(new_h, out_ref, tile_b, n_nodes, hidden):
    # Vectorized sum over the parent-node axis + ONE dense (tile_b*N, H) store
    # (review #6: no per-batch loop / masked sub-8-sublane vst).
    red = jnp.sum(new_h.reshape(tile_b, n_nodes, n_nodes, hidden), axis=1)
    out_ref[...] = red.reshape(tile_b * n_nodes, hidden)


# ----------------------------------------------------------------------------
# Variant A: in-kernel gather from the resident hsl table (default on v5e).
# ----------------------------------------------------------------------------
def _gru_gather_kernel(x_idx_ref, h_idx_ref,            # scalar prefetch (SMEM)
                       hsl_ref, *refs,
                       tile_b, n_nodes, hidden, fuse_n):
    n_w = 1 if fuse_n else 3
    w_refs = refs[:n_w]
    b_refs = refs[n_w:2 * n_w]
    out_ref = refs[2 * n_w]
    xh_ref = refs[2 * n_w + 1]
    H = hidden
    tile_m = tile_b * n_nodes * n_nodes
    row0 = pl.program_id(0) * tile_m

    # Gather rows straight into ONE combined (tile_m, 2H) scratch
    # (x -> lanes [:H], h -> lanes [H:]).  Partially unrolled (8 rows per
    # rolled iteration) so SMEM index reads overlap the row copies (review #1).
    def copy_row(m):
        xi = x_idx_ref[row0 + m]
        hi = h_idx_ref[row0 + m]
        xh_ref[pl.ds(m, 1), :H] = hsl_ref[pl.ds(xi, 1), :]
        xh_ref[pl.ds(m, 1), H:] = hsl_ref[pl.ds(hi, 1), :]

    UNROLL = 8
    n_blocks = tile_m // UNROLL

    def gather_block(i, carry):
        base = i * UNROLL
        for u in range(UNROLL):
            copy_row(base + u)
        return carry

    if n_blocks:
        lax.fori_loop(0, n_blocks, gather_block, 0)
    for m in range(n_blocks * UNROLL, tile_m):          # static remainder
        copy_row(m)

    xh = xh_ref[...]                                    # (tile_m, 2H) f32
    new_h = _gru_gates(xh.astype(MXU_DTYPE), xh[:, H:],
                       w_refs, b_refs, H, fuse_n)
    _store_parent_sum(new_h, out_ref, tile_b, n_nodes, H)


def gru_pass_pallas_gather(hsl, x_idx, h_idx, gru_params, *,
                           n_batch, n_nodes, hidden, fuse_n=None):
    """One GRUCell pass (in-kernel gather + GRU + parent-axis sum) -> (B*N, H)."""
    H = hidden
    assert H % 128 == 0, "hidden must be lane-aligned (multiple of 128)"
    if fuse_n is None:
        fuse_n = _FUSE_N_GATES_DEFAULT
    nn = n_nodes * n_nodes
    bn = n_batch * n_nodes
    rows = n_batch * nn
    weights, biases = _prep_gru_weights(gru_params, H, fuse_n)

    tile_b = _pick_tile_b(n_batch, n_nodes, H)
    tile_m = tile_b * nn
    num_tiles = n_batch // tile_b

    kernel = functools.partial(_gru_gather_kernel, tile_b=tile_b,
                               n_nodes=n_nodes, hidden=H, fuse_n=fuse_n)
    cmap = lambda t, xi, hi: (0, 0)                     # grid-invariant blocks
    in_specs = ([_const_spec((bn + 1, H), cmap)]
                + [_const_spec(w.shape, cmap) for w in weights]
                + [_const_spec(b.shape, cmap) for b in biases])
    grid_spec = pltpu.PrefetchScalarGridSpec(
        num_scalar_prefetch=2,
        grid=(num_tiles,),
        in_specs=in_specs,
        out_specs=pl.BlockSpec((tile_b * n_nodes, H), lambda t, xi, hi: (t, 0)),
        scratch_shapes=[pltpu.VMEM((tile_m, 2 * H), jnp.float32)])

    const_bytes = ((bn + 1) * H * 4
                   + sum(int(np.prod(w.shape)) * 2 for w in weights)
                   + sum(int(np.prod(b.shape)) * 4 for b in biases))
    buf_mult = 1 if _single_buffer_consts_supported() else 2
    vmem_est = (buf_mult * const_bytes
                + 2 * tile_b * n_nodes * H * 4           # double-buffered output
                + tile_m * 2 * H * 4                     # gather scratch
                + 14 * tile_m * H * 4)                   # f32 gate temporaries
    flops = 2 * rows * (2 * H) * (4 * H if fuse_n else 3 * H)
    cost = pl.CostEstimate(
        flops=int(flops),
        transcendentals=int(rows * 3 * H),
        bytes_accessed=int(const_bytes + bn * H * 4 + 2 * rows * 4))

    return pl.pallas_call(
        kernel,
        out_shape=jax.ShapeDtypeStruct((bn, H), jnp.float32),
        grid_spec=grid_spec,
        compiler_params=pltpu.CompilerParams(
            dimension_semantics=("parallel",),
            vmem_limit_bytes=int(min(120 << 20, max(32 << 20, 2 * vmem_est)))),
        cost_estimate=cost,
    )(x_idx.astype(jnp.int32), h_idx.astype(jnp.int32), hsl, *weights, *biases)


# ----------------------------------------------------------------------------
# Variant B: gather lifted to XLA, operands streamed (default on v6e/v7x).
# ----------------------------------------------------------------------------
def _gru_stream_kernel(x_ref, h_ref, *refs, tile_b, n_nodes, hidden, fuse_n):
    n_w = 1 if fuse_n else 3
    w_refs = refs[:n_w]
    b_refs = refs[n_w:2 * n_w]
    out_ref = refs[2 * n_w]
    h = h_ref[...].astype(jnp.float32)                  # (tile_m, H) f32
    xh16 = jnp.concatenate(
        [x_ref[...].astype(MXU_DTYPE), h.astype(MXU_DTYPE)], axis=1)
    new_h = _gru_gates(xh16, h, w_refs, b_refs, hidden, fuse_n)
    _store_parent_sum(new_h, out_ref, tile_b, n_nodes, hidden)


def gru_pass_pallas_stream(hsl, x_idx, h_idx, gru_params, *,
                           n_batch, n_nodes, hidden, fuse_n=None):
    """One GRUCell pass with the row gather done by XLA (jnp.take) and the
    duplicated operands streamed through the BlockSpec pipeline (review #2/#3)."""
    H = hidden
    assert H % 128 == 0, "hidden must be lane-aligned (multiple of 128)"
    if fuse_n is None:
        fuse_n = _FUSE_N_GATES_DEFAULT
    nn = n_nodes * n_nodes
    bn = n_batch * n_nodes
    rows = n_batch * nn
    weights, biases = _prep_gru_weights(gru_params, H, fuse_n)

    tile_b = _pick_tile_b(n_batch, n_nodes, H)
    tile_m = tile_b * nn
    num_tiles = n_batch // tile_b

    # x streamed in bf16 (halves HBM bytes), h in f32 (exact final blend).
    x_dtype = MXU_DTYPE if tile_m % 16 == 0 else jnp.float32
    x_gath = jnp.take(hsl, x_idx, axis=0).astype(x_dtype)    # (rows, H)
    h_gath = jnp.take(hsl, h_idx, axis=0)                    # (rows, H) f32

    kernel = functools.partial(_gru_stream_kernel, tile_b=tile_b,
                               n_nodes=n_nodes, hidden=H, fuse_n=fuse_n)
    cmap = lambda t: (0, 0)
    in_specs = ([pl.BlockSpec((tile_m, H), lambda t: (t, 0)),
                 pl.BlockSpec((tile_m, H), lambda t: (t, 0))]
                + [_const_spec(w.shape, cmap) for w in weights]
                + [_const_spec(b.shape, cmap) for b in biases])

    const_bytes = (sum(int(np.prod(w.shape)) * 2 for w in weights)
                   + sum(int(np.prod(b.shape)) * 4 for b in biases))
    buf_mult = 1 if _single_buffer_consts_supported() else 2
    x_bytes = jnp.dtype(x_dtype).itemsize
    vmem_est = (buf_mult * const_bytes
                + 2 * tile_m * H * (x_bytes + 4)          # streamed x/h blocks
                + 2 * tile_b * n_nodes * H * 4
                + 14 * tile_m * H * 4)
    flops = 2 * rows * (2 * H) * (4 * H if fuse_n else 3 * H)
    cost = pl.CostEstimate(
        flops=int(flops),
        transcendentals=int(rows * 3 * H),
        bytes_accessed=int(const_bytes + rows * H * (x_bytes + 4) + bn * H * 4))

    return pl.pallas_call(
        kernel,
        out_shape=jax.ShapeDtypeStruct((bn, H), jnp.float32),
        grid=(num_tiles,),
        in_specs=in_specs,
        out_specs=pl.BlockSpec((tile_b * n_nodes, H), lambda t: (t, 0)),
        compiler_params=pltpu.CompilerParams(
            dimension_semantics=("parallel",),
            vmem_limit_bytes=int(min(120 << 20, max(32 << 20, 2 * vmem_est)))),
        cost_estimate=cost,
    )(x_gath, h_gath, *weights, *biases)


def gru_pass_pallas(hsl, x_idx, h_idx, gru_params, **kw):
    fn = gru_pass_pallas_stream if _STREAM_GATHER_DEFAULT else gru_pass_pallas_gather
    return fn(hsl, x_idx, h_idx, gru_params, **kw)


# ----------------------------------------------------------------------------
# Pure-JAX reference for the same pass (mirrors the bf16 MXU operand rounding).
# ----------------------------------------------------------------------------
def gru_pass_ref(hsl, x_idx, h_idx, gru_params, *, n_batch, n_nodes, hidden):
    w_ih, w_hh, b_ih, b_hh = gru_params
    H = hidden
    x = jnp.take(hsl, x_idx, axis=0)
    h = jnp.take(hsl, h_idx, axis=0)
    x16 = x.astype(MXU_DTYPE)
    h16 = h.astype(MXU_DTYPE)
    gi = jnp.dot(x16, w_ih.astype(MXU_DTYPE).T,
                 preferred_element_type=jnp.float32) + b_ih
    gh = jnp.dot(h16, w_hh.astype(MXU_DTYPE).T,
                 preferred_element_type=jnp.float32) + b_hh
    r = jax.nn.sigmoid(gi[:, :H] + gh[:, :H])
    z = jax.nn.sigmoid(gi[:, H:2 * H] + gh[:, H:2 * H])
    n = jnp.tanh(gi[:, 2 * H:] + r * gh[:, 2 * H:])
    new_h = (1.0 - z) * n + z * h
    out = jnp.sum(new_h.reshape(n_batch, n_nodes, n_nodes, H), axis=1)
    return out.reshape(n_batch * n_nodes, H)


# ----------------------------------------------------------------------------
# GSN_matrix forward (graph glue in plain JAX, GRU passes fused in Pallas).
# ----------------------------------------------------------------------------
def gsn_matrix_forward(params, group_lst, *, n_batch, n_nodes, n_token,
                       n_token_dim, pass_fn):
    H = n_token * n_token_dim

    # _get_tgt_embeddings
    tgt_idx = group_lst["tgt_idx"] + jnp.arange(n_batch, dtype=jnp.int32) * n_nodes + 1

    # _build_matirx
    state_matrix = group_lst["state_matrix"]        # (B, N, N) f32 (diagonal ids)
    struct_conv = group_lst["struct_conv"]          # (B, N, N) f32 (0/1 adjacency)
    hsl = jnp.concatenate(
        [jnp.zeros((1, H), jnp.float32),
         group_lst["input_split_encode"].reshape(n_batch * n_nodes, H)], axis=0)
    hsl = hsl.at[tgt_idx].set(group_lst["sample"].reshape(n_batch, H))

    # _compute_update_info: index tables (exact while node ids < 2^24; rounded
    # before the int cast as a guard).
    # TODO(synk): switch to an integer/diagonal formulation for graphs with node
    # ids >= 2^24 (latent f32 precision loss beyond that).
    struct_child = jnp.round(jnp.matmul(state_matrix, struct_conv)).astype(jnp.int32)
    struct_parent = jnp.round(jnp.matmul(struct_conv, state_matrix)).astype(jnp.int32)
    child_idx = struct_child.reshape(-1)            # (B*N*N,)
    parent_idx = struct_parent.reshape(-1)          # (B*N*N,)

    # backward GRU: p_change = gru_bwd(input=S_c, hidden=S_p), summed over dim 1.
    # TODO(synk): dropout layers are identity here (eval / p = 0.0).
    p_change = pass_fn(hsl, child_idx, parent_idx, params["gru_bwd"],
                       n_batch=n_batch, n_nodes=n_nodes, hidden=H)   # (B*N, H)
    hsl = hsl.at[1:, :].add(p_change)

    # forward GRU: c_change = gru_fwd(input=S_p, hidden=S_c) on the updated list.
    c_change = pass_fn(hsl, parent_idx, child_idx, params["gru_fwd"],
                       n_batch=n_batch, n_nodes=n_nodes, hidden=H)   # (B*N, H)
    hsl = hsl.at[1:, :].add(c_change)

    tgt_hidden_state = jnp.take(hsl, tgt_idx, axis=0)                # (B, H)
    return tgt_hidden_state.reshape(n_batch, n_token, n_token_dim)


# ----------------------------------------------------------------------------
# Deterministic parameter / input construction.
# ----------------------------------------------------------------------------
def make_gru_params(key, hidden):
    k = 1.0 / np.sqrt(hidden)
    ks = jax.random.split(key, 4)
    w_ih = jax.random.uniform(ks[0], (3 * hidden, hidden), jnp.float32, -k, k)
    w_hh = jax.random.uniform(ks[1], (3 * hidden, hidden), jnp.float32, -k, k)
    b_ih = jax.random.uniform(ks[2], (3 * hidden,), jnp.float32, -k, k)
    b_hh = jax.random.uniform(ks[3], (3 * hidden,), jnp.float32, -k, k)
    return (w_ih, w_hh, b_ih, b_hh)


if __name__ == "__main__":
    n_batch, n_nodes, n_token, n_token_dim = 2, 4, 8, 16
    H = n_token * n_token_dim                       # 128

    _single_buffer_consts_supported()               # warm the capability probe

    root = jax.random.PRNGKey(0)
    k_fwd, k_bwd, k_enc, k_smp = jax.random.split(root, 4)
    params = {
        "gru_fwd": make_gru_params(k_fwd, H),
        "gru_bwd": make_gru_params(k_bwd, H),
    }

    # Deterministic graph structure (mirrors _build_matirx without padding):
    #  - state_matrix: diagonal id  n_nodes*i + j + 1
    #  - struct_conv : child j has parent j-1
    diag_vals = (jnp.arange(n_batch)[:, None] * n_nodes
                 + jnp.arange(n_nodes)[None, :] + 1).astype(jnp.float32)
    state_matrix = jax.vmap(jnp.diag)(diag_vals)                    # (B, N, N)
    sc = np.zeros((n_batch, n_nodes, n_nodes), np.float32)
    for i in range(n_batch):
        for j in range(1, n_nodes):
            sc[i, j, j - 1] = 1.0
    struct_conv = jnp.asarray(sc)

    group_lst = {
        "tgt_idx": jnp.array([1, 2], dtype=jnp.int32),              # (B,)
        "state_matrix": state_matrix,
        "struct_conv": struct_conv,
        "input_split_encode": jax.random.normal(
            k_enc, (n_batch, n_nodes, n_token, n_token_dim), jnp.float32),
        "sample": jax.random.normal(
            k_smp, (n_batch, n_token, n_token_dim), jnp.float32),
    }

    common = dict(n_batch=n_batch, n_nodes=n_nodes,
                  n_token=n_token, n_token_dim=n_token_dim)
    fwd_ref = jax.jit(functools.partial(
        gsn_matrix_forward, pass_fn=gru_pass_ref, **common))
    ref = jax.block_until_ready(fwd_ref(params, group_lst))
    assert ref.shape == (n_batch, n_token, n_token_dim)

    # Validate both Pallas variants (the platform default, gru_pass_pallas,
    # picks the streamed gather on v6e/v7x and the in-kernel gather on v5e).
    for pass_fn in (gru_pass_pallas_gather, gru_pass_pallas_stream):
        fwd = jax.jit(functools.partial(
            gsn_matrix_forward, pass_fn=pass_fn, **common))
        out = jax.block_until_ready(fwd(params, group_lst))
        assert out.shape == (n_batch, n_token, n_token_dim)
        # bf16 MXU operands -> tolerance looser than an f32-only check; the
        # reference mirrors the same operand rounding so this stays tight.
        np.testing.assert_allclose(np.asarray(out), np.asarray(ref),
                                   rtol=5e-3, atol=5e-3)
    print("KERNEL_OK")
</pallas_src>

<mosaic_0001>
module attributes {stable_mosaic.version = 11 : i64} {
  func.func @_k(%arg0: i32, %arg1: memref<1xi32, #tpu.memory_space<smem>>, %arg2: memref<8x128xf32, #tpu.memory_space<vmem>>, %arg3: memref<8x128xf32, #tpu.memory_space<vmem>>, %arg4: memref<8x128xf32, #tpu.memory_space<vmem>>) attributes {dimension_semantics = [#tpu.dimension_semantics<arbitrary>], iteration_bounds = array<i64: 2>, scalar_prefetch = 1 : i64, scratch_operands = 1 : i64, tpu.core_type = #tpu.core_type<tc>, window_params = [{pipeline_mode = #tpu.pipeline_mode<synchronous>, transform_indices = @transform_0, window_bounds = array<i64: 8, 128>}, {pipeline_mode = #tpu.pipeline_mode<synchronous>, transform_indices = @transform_1, window_bounds = array<i64: 8, 128>}]} {
    %c0 = arith.constant 0 : index
    %c0_0 = arith.constant 0 : index
    %0 = vector.load %arg2[%c0, %c0_0] : memref<8x128xf32, #tpu.memory_space<vmem>>, vector<8x128xf32>
    %cst = arith.constant 2.000000e+00 : f32
    %1 = vector.broadcast %cst : f32 to vector<8x128xf32>
    %2 = arith.mulf %0, %1 : vector<8x128xf32>
    %c0_1 = arith.constant 0 : index
    %c0_2 = arith.constant 0 : index
    %3 = vector.load %arg4[%c0_1, %c0_2] : memref<8x128xf32, #tpu.memory_space<vmem>>, vector<8x128xf32>
    tpu.vector_store %arg4[%c0_1, %c0_2], %2 {strides = array<i32>} : memref<8x128xf32, #tpu.memory_space<vmem>>, vector<8x128xf32>,
    %c0_3 = arith.constant 0 : index
    %c0_4 = arith.constant 0 : index
    %4 = vector.load %arg4[%c0_3, %c0_4] : memref<8x128xf32, #tpu.memory_space<vmem>>, vector<8x128xf32>
    %c0_5 = arith.constant 0 : index
    %c0_6 = arith.constant 0 : index
    %5 = vector.load %arg3[%c0_5, %c0_6] : memref<8x128xf32, #tpu.memory_space<vmem>>, vector<8x128xf32>
    tpu.vector_store %arg3[%c0_5, %c0_6], %4 {strides = array<i32>} : memref<8x128xf32, #tpu.memory_space<vmem>>, vector<8x128xf32>,
    return
  }
  func.func @transform_0(%arg0: i32, %arg1: memref<1xi32, #tpu.memory_space<smem>>) -> (i32, i32) {
    %c0_i32 = arith.constant 0 : i32
    %c0_i32_0 = arith.constant 0 : i32
    %c0_i32_1 = arith.constant 0 : i32
    return %c0_i32, %c0_i32_0 : i32, i32
  }
  func.func @transform_1(%arg0: i32, %arg1: memref<1xi32, #tpu.memory_space<smem>>) -> (i32, i32) {
    %c0_i32 = arith.constant 0 : i32
    %c0_i32_0 = arith.constant 0 : i32
    %c0_i32_1 = arith.constant 0 : i32
    return %c0_i32, %c0_i32_0 : i32, i32
  }
}

</mosaic_0001>

<bundles_post_ra>
// kernel: tpu_custom_call.1
= control target key start
LH: loop header
LB: loop body
LE: loop exit
PB: predicated region body
PF: predicated region fallthrough
CT: control target
= control target key end

     0   :  { %8 = vsyncpa [#allocation6], 0  ;;  %s350_s0 = inlined_call_operand.<no memory space> [shape: s32[1], index: 0, kind: input, shape index: {}]   ;;  %s351_s1 = inlined_call_operand.hbm [shape: f32[8,128], index: 1, kind: input, shape index: {}]   ;;  %s352_s2 = inlined_call_operand.hbm [shape: f32[8,128], index: 2, kind: output, shape index: {}]  }
   0x1   :  { %9 = vsyncpa [#allocation7], 0  ;;  %s271_s9 = smov 0  }
   0x2 LB: > { %s149_s0 = sadd.s32 4294967295, %s252_s9   ;;  %p150_p0 = scmp.ge.s32.totalorder %s252_s9, 1  ;;  %s252_s9 = sphi %s271_s9, %s15_s9  }
   0x3   : > { %p62_p1 = scmp.lt.s32.totalorder %s252_s9, 3  ;;  %p285_p3 = scmp.eq.s32.totalorder %s149_s0, 0 }
   0x4   : > { %s254_s12 = smov [#allocation5]   ;;  %s184_s17 = scalar_lea.hbm %s351_s1, 128 }
   0x5   : > { %p279_p2 = pnand %p150_p0, %p62_p1  ;;  %s75_s13 = sshll.u32 %s254_s12, 4  ;;  %s76_s13 = int_to_ptr.vmem [resolvable:$true] %s75_s13 }
   0x6   : > { %s357_s11 = scalar_select %p285_p3, 1, 0 }
   0x7   : > { %s356_s10 = scalar_select %p279_p2, 1, 0 }
   0x8   : > { %p166_p4 = pneg %p279_p2  ;;  %p185_p6 = scmp.ne.s32.totalorder %s351_s1, %s184_s17 }
   0x9   : > { %p191_p10 = scmp.lt.u32.totalorder %s184_s17, %s351_s1 }
   0xa   : > { %p293_p5 = pnand %p285_p3, %p166_p4 }
   0xc   : > { %p186_p7 = pneg %p293_p5 }
   0xe   : > { %p187_p8 = pnand %p186_p7, %p185_p6 }
  0x10   : > { %p188_p9 = pneg %p187_p8 }
  0x12   : > { %p193_p11 = pnand %p191_p10, %p188_p9 }
  0x14   : > { %196 = shalt.err (!%p193_p11)
}
  0x15   : > { %s197_s22 = scalar_lea.vmem %s76_s13, 128  ;;  %p205_p1 = scmp.lt.s32.totalorder %s76_s13, %s76_s13 }
  0x16   : > { %p198_p12 = scmp.ne.s32.totalorder %s76_s13, %s197_s22  ;;  %p206_p4 = scmp.lt.s32.totalorder %s197_s22, %s197_s22 }
  0x18   : > { %p200_p13 = pnand %p198_p12, %p186_p7  ;;  %p207_p3 = por %p206_p4, %p205_p1 }
  0x1a   : > { %p201_p0 = pneg %p200_p13 }
  0x1c   : > { %p208_p2 = pnand %p207_p3, %p201_p0 }
  0x1e   : > { %211 = shalt.err (!%p208_p2)
}
  0x1f   : > { %169 = dma.hbm_to_vmem [thread:$0]  (!%p293_p5), %s351_s1, 128, %s76_s13, [#allocation6]  }
  0x20   : > { %p359_p6 = scmp.ne.s32.totalorder %s356_s10, 0 }
  0x21   : > { %p360_p8 = scmp.ne.s32.totalorder (!%p359_p6), %s357_s11, 0 }
  0x22   : > { %88 = sbr.rel (%p359_p6) target bundleno = 67 (0x43), region = 24 }
  0x29   : > { %243 = dma.done.wait (%p360_p8), [#allocation6], 128  }
  0x2a   : > { %245 = vsyncadd (%p360_p8), [#allocation6], 4294967168  ;;  %s255_s25 = smov [#allocation8]   ;;  %v98_v0 = vld [vmem:[#allocation5] sm:$0xff]  ;;  %p321_p2 = scmp.eq.s32.totalorder %s149_s0, 1 }
  0x2b   : > { %s110_s26 = sshll.u32 %s255_s25, 4  ;;  %v99_v1 = vmul.f32 2.0, %v98_v0  ;;  %s111_s26 = int_to_ptr.vmem [resolvable:$true] %s110_s26 }
  0x2c   : > { %s212_s28 = scalar_lea.vmem %s111_s26, 128  ;;  %p219_p9 = scmp.lt.s32.totalorder %s111_s26, %s111_s26 }
  0x2d   : > { %102 = vst [vmem:[#allocation8] sm:$0xff] %v99_v1  ;;  %p213_p3 = scmp.ne.s32.totalorder %s111_s26, %s212_s28  ;;  %p220_p10 = scmp.lt.s32.totalorder %s212_s28, %s212_s28 }
  0x2f   : > { %p214_p5 = pnand %p213_p3, %p321_p2  ;;  %p221_p11 = por %p220_p10, %p219_p9 }
  0x31   : > { %p215_p7 = pneg %p214_p5 }
  0x33   : > { %p222_p12 = pnand %p221_p11, %p215_p7 }
  0x35   : > { %225 = shalt.err (!%p222_p12)
}
  0x36   : > { %s226_s3 = scalar_lea.hbm %s352_s2, 128 }
  0x37   : > { %p227_p13 = scmp.ne.s32.totalorder %s352_s2, %s226_s3  ;;  %p232_p4 = scmp.lt.u32.totalorder %s226_s3, %s352_s2 }
  0x39   : > { %p228_p0 = pnand %p227_p13, %p321_p2 }
  0x3b   : > { %p229_p1 = pneg %p228_p0 }
  0x3d   : > { %p234_p6 = pnand %p232_p4, %p229_p1 }
  0x3f   : > { %237 = shalt.err (!%p234_p6)
}
  0x40   : > { %163 = dma.vmem_to_hbm [thread:$0]  (%p321_p2), %s111_s26, 128, %s352_s2, [#allocation7]  }
  0x41   : > { %247 = dma.done.wait (%p321_p2), [#allocation7], 128  }
  0x42   : > { %249 = vsyncadd (%p321_p2), [#allocation7], 4294967168 }
  0x43 PF: > { %s15_s9 = sadd.s32 1, %s252_s9  }
  0x44   : > { %p12_p8 = scmp.ge.s32.totalorder %s15_s9, 4  }
  0x46   :  { %14 = sbr.rel (!%p12_p8) target bundleno = 2 (0x2), region = 53 }
  0x4d   :  { %123 = vsyncpa [#allocation6], 1 }
  0x4e   :  { %125 = vsyncpa [#allocation6 + $0x1], 1 }
  0x4f   :  { %126 = vsyncpa [#allocation7], 1 }
  0x50   :  { %128 = vsyncpa [#allocation7 + $0x1], 1 }

</bundles_post_ra>
